<compile_context>
chip_gen: v5e
topology: v5e:2x2
jax: 0.10.0
libtpu: 0.0.40
codegen_flags: <defaults>
</compile_context>

<pallas_src>
import functools

import numpy as np
import jax
import jax.numpy as jnp
from jax.experimental import pallas as pl
from jax.experimental.pallas import tpu as pltpu


# ---------------------------------------------------------------------------
# Config (mirrors the fields the PyTorch module reads)
# ---------------------------------------------------------------------------
class Config:
    scale_recon_loss = 1.0
    scale_bspline_loss = 0.1
    scale_overlap_loss = 0.01
    scale_parsimony_loss = 0.001
    overlap_threshold = 4.0
    bspline_control_points = 4   # n
    bspline_order = 2            # k


# ---------------------------------------------------------------------------
# Deterministic B-spline basis matrix (Cox-de Boor recursion).
# Stands in for utils.BsplineCache().get_bspline_coefficient(n, k, T).
# ---------------------------------------------------------------------------
def bspline_basis_matrix(n, k, num_t):
    t = np.linspace(0.0, 0.9999, num_t).astype(np.float64)[:, None]        # (T, 1)
    knots = np.concatenate(
        [np.zeros(k), np.linspace(0.0, 1.0, n - k + 1), np.ones(k)]
    ).astype(np.float64)[None, :]                                          # (1, n+k+1)
    basis = ((t >= knots[:, :-1]) & (t < knots[:, 1:])).astype(np.float64)  # degree 0
    for d in range(1, k + 1):
        left_den = knots[:, d:-1] - knots[:, :-(d + 1)]
        right_den = knots[:, d + 1:] - knots[:, 1:-d]
        left = np.where(
            left_den > 0.0,
            (t - knots[:, :-(d + 1)]) / np.where(left_den > 0.0, left_den, 1.0),
            0.0)
        right = np.where(
            right_den > 0.0,
            (knots[:, d + 1:] - t) / np.where(right_den > 0.0, right_den, 1.0),
            0.0)
        basis = left * basis[:, :-1] + right * basis[:, 1:]
    return jnp.asarray(basis, dtype=jnp.float32)                            # (T, n)


# ---------------------------------------------------------------------------
# Single fused Pallas kernel: all four losses in one invocation
# ---------------------------------------------------------------------------
def _fused_loss_kernel(skel_ref, ctrl_t_ref, basis_bd_ref, pred_ref, gt_ref,
                       occ_ref, w_ref, out_ref, *,
                       batch, scale_recon, scale_bspline, scale_overlap,
                       scale_pars, overlap_free):
    # ---- reconstruction MSE (lane-dense (R, 128) slab) ---------------------
    diff = pred_ref[...] - gt_ref[...]
    out_ref[batch + 0] = scale_recon * jnp.mean(diff * diff)

    # ---- overlap penalty: occupancy is (K, B*Q) -> sublane reduce ----------
    occ = occ_ref[...]
    mask = (occ > 0.5).astype(jnp.float32)
    num_at_point = jnp.sum(occ * mask, axis=0, keepdims=True)     # (1, B*Q)
    penalty = jnp.maximum(num_at_point - overlap_free, 0.0)
    out_ref[batch + 1] = scale_overlap * jnp.mean(penalty)

    # ---- parsimony ---------------------------------------------------------
    w = w_ref[...]                                                # (B, K)
    out_ref[batch + 2] = scale_pars * jnp.sqrt(jnp.sum(jax.nn.sigmoid(w)))

    # ---- b-spline chamfer loss ---------------------------------------------
    # ONE MXU dot generates all curve samples for every batch, coord-major:
    # ctrl_t (B*8, N*n) @ basis_bd (N*n, L) -> (B*8, L), L = N*T on lanes.
    curves_all = jnp.dot(ctrl_t_ref[...], basis_bd_ref[...],
                         preferred_element_type=jnp.float32)      # (B*8, L)
    for b in range(batch):                                        # static unroll (B tiny)
        skel = skel_ref[b]                                        # (M, 8)  (xyz + zero pad)
        curves_t = curves_all[b * 8:(b + 1) * 8, :]               # (8, L) sublane-aligned slice
        # squared pairwise distances: one MXU dot for the cross term,
        # rank-1 squared-norm corrections added once (not per coordinate).
        cross = jnp.dot(skel, curves_t,
                        preferred_element_type=jnp.float32)       # (M, L)
        a_n2 = jnp.sum(skel * skel, axis=1, keepdims=True)        # (M, 1)
        b_n2 = jnp.sum(curves_t * curves_t, axis=0, keepdims=True)  # (1, L)
        d2 = a_n2 + b_n2 - 2.0 * cross                            # (M, L)
        # sqrt AFTER the min reductions (monotone): M + L sqrts, not M*L.
        min_a = jnp.maximum(jnp.min(d2, axis=1, keepdims=True), 0.0)  # (M, 1)
        min_b = jnp.maximum(jnp.min(d2, axis=0, keepdims=True), 0.0)  # (1, L)
        chamfer = jnp.mean(jnp.sqrt(min_a)) + jnp.mean(jnp.sqrt(min_b))
        out_ref[b] = scale_bspline * chamfer


# ---------------------------------------------------------------------------
# Full Loss.forward
# ---------------------------------------------------------------------------
def loss_forward(config, basis, predict_occupancy, gt_occupancy,
                 occupancy_pre_union, primitive_parameters,
                 union_layer_weights, skeleton_points):
    f32 = jnp.float32
    B, N, _ = primitive_parameters.shape
    n = config.bspline_control_points
    T = basis.shape[0]
    K = occupancy_pre_union.shape[2]

    # ---- KB-scale layout glue (fused by XLA around the single call) -------
    # weighted control points, coordinate-major, coord dim padded 3 -> 8,
    # stacked over batch so the kernel runs ONE curve-generation matmul.
    pp_sel = (primitive_parameters * union_layer_weights[..., None]).astype(f32)
    ctrl = pp_sel[:, :, :n * 3].reshape(B, N * n, 3)
    ctrl_t = jnp.transpose(ctrl, (0, 2, 1))                        # (B, 3, N*n)
    ctrl_t_p = jnp.pad(ctrl_t, ((0, 0), (0, 5), (0, 0)))           # (B, 8, N*n)
    ctrl_stacked = ctrl_t_p.reshape(B * 8, N * n)                  # (B*8, N*n)

    # block-diagonal basis, transposed: (N*n, N*T) so curves come out (coord, L)
    basis_bd = jnp.transpose(
        jnp.kron(jnp.eye(N, dtype=f32), basis.astype(f32)), (1, 0))

    # skeleton points, coord dim padded 3 -> 8 (zeros contribute nothing)
    skel_p = jnp.pad(skeleton_points.astype(f32), ((0, 0), (0, 0), (0, 5)))

    # lane-dense recon slabs, sublane-major occupancy
    BQ = predict_occupancy.shape[0] * predict_occupancy.shape[1]
    cols = 128 if BQ % 128 == 0 else BQ
    pred2 = predict_occupancy.astype(f32).reshape(-1, cols)
    gt2 = gt_occupancy.astype(f32).reshape(-1, cols)
    occ_t = jnp.transpose(occupancy_pre_union.astype(f32).reshape(-1, K), (1, 0))
    w = union_layer_weights.astype(f32)

    kern = functools.partial(
        _fused_loss_kernel, batch=B,
        scale_recon=float(config.scale_recon_loss),
        scale_bspline=float(config.scale_bspline_loss),
        scale_overlap=float(config.scale_overlap_loss),
        scale_pars=float(config.scale_parsimony_loss),
        overlap_free=float(int(K / config.overlap_threshold)))

    out = pl.pallas_call(
        kern,
        out_shape=jax.ShapeDtypeStruct((B + 3,), f32),
        grid=(1,),
        in_specs=[
            pl.BlockSpec(skel_p.shape, lambda i: (0, 0, 0)),
            pl.BlockSpec(ctrl_stacked.shape, lambda i: (0, 0)),
            pl.BlockSpec(basis_bd.shape, lambda i: (0, 0)),
            pl.BlockSpec(pred2.shape, lambda i: (0, 0)),
            pl.BlockSpec(gt2.shape, lambda i: (0, 0)),
            pl.BlockSpec(occ_t.shape, lambda i: (0, 0)),
            pl.BlockSpec(w.shape, lambda i: (0, 0)),
        ],
        out_specs=pl.BlockSpec((B + 3,), lambda i: (0,),
                               memory_space=pltpu.SMEM),
        compiler_params=pltpu.CompilerParams(
            dimension_semantics=("arbitrary",)),
    )(skel_p, ctrl_stacked, basis_bd, pred2, gt2, occ_t, w)

    loss_bspline = out[:B]            # per-batch vector, matches the reference
    loss_recon = out[B]
    loss_overlap = out[B + 1]
    loss_parsimony = out[B + 2]
    loss_total = loss_recon + loss_bspline + loss_overlap + loss_parsimony
    return {
        'loss_recon': loss_recon,
        'loss_bspline': loss_bspline,
        'loss_parsimony': loss_parsimony,
        'loss_overlap': loss_overlap,
        'loss_total': loss_total,
    }


# ---------------------------------------------------------------------------
# Pure-JAX reference (sanity check only)
# ---------------------------------------------------------------------------
def loss_reference(config, basis, predict_occupancy, gt_occupancy,
                   occupancy_pre_union, primitive_parameters,
                   union_layer_weights, skeleton_points):
    B, N, _ = primitive_parameters.shape
    n = config.bspline_control_points
    K = occupancy_pre_union.shape[2]
    loss_recon = config.scale_recon_loss * jnp.mean(
        (predict_occupancy - gt_occupancy) ** 2)
    mask = (occupancy_pre_union > 0.5).astype(jnp.float32)
    num_at_point = jnp.sum(occupancy_pre_union * mask, axis=2)
    penalty = jnp.maximum(num_at_point - int(K / config.overlap_threshold), 0.0)
    loss_overlap = config.scale_overlap_loss * jnp.mean(penalty)
    loss_pars = config.scale_parsimony_loss * jnp.sqrt(
        jnp.sum(jax.nn.sigmoid(union_layer_weights)))
    pp_sel = primitive_parameters * union_layer_weights[..., None]
    ctrl = pp_sel[:, :, :n * 3].reshape(B * N, n, 3)
    curves = jnp.einsum('tn,pnc->ptc', basis, ctrl,
                        precision=jax.lax.Precision.HIGHEST).reshape(B, -1, 3)
    dists = jnp.linalg.norm(
        skeleton_points[:, :, None, :] - curves[:, None, :, :], axis=3)
    ch_a = jnp.mean(jnp.min(dists, axis=2), axis=1)
    ch_b = jnp.mean(jnp.min(dists, axis=1), axis=1)
    loss_bspline = (ch_a + ch_b) * config.scale_bspline_loss
    total = loss_recon + loss_bspline + loss_overlap + loss_pars
    return {'loss_recon': loss_recon, 'loss_bspline': loss_bspline,
            'loss_parsimony': loss_pars, 'loss_overlap': loss_overlap,
            'loss_total': total}


if __name__ == "__main__":
    cfg = Config()
    key = jax.random.PRNGKey(0)
    ks = jax.random.split(key, 6)

    B, Q, K, M = 2, 256, 8, 64       # batch, query points, primitives, skeleton pts
    P = 16                           # primitive parameter dim (>= n*3 = 12)

    predict_occupancy = jax.random.uniform(ks[0], (B, Q), jnp.float32)
    gt_occupancy = (jax.random.uniform(ks[1], (B, Q), jnp.float32) > 0.5
                    ).astype(jnp.float32)
    occupancy_pre_union = jax.random.uniform(ks[2], (B, Q, K), jnp.float32)
    primitive_parameters = jax.random.normal(ks[3], (B, K, P), jnp.float32)
    union_layer_weights = jax.random.normal(ks[4], (B, K), jnp.float32)
    skeleton_points = jax.random.normal(ks[5], (B, M, 3), jnp.float32)

    basis = bspline_basis_matrix(cfg.bspline_control_points, cfg.bspline_order, 16)

    loss_fn = jax.jit(functools.partial(loss_forward, cfg, basis))
    out = loss_fn(predict_occupancy, gt_occupancy, occupancy_pre_union,
                  primitive_parameters, union_layer_weights, skeleton_points)
    out = jax.tree_util.tree_map(jax.block_until_ready, out)

    ref = loss_reference(cfg, basis, predict_occupancy, gt_occupancy,
                         occupancy_pre_union, primitive_parameters,
                         union_layer_weights, skeleton_points)

    # Tight tolerance for the exact element-wise losses; slightly looser for
    # the chamfer path whose matmuls may use MXU reduced-precision passes.
    tols = {'loss_recon': (1e-4, 1e-6), 'loss_overlap': (1e-4, 1e-6),
            'loss_parsimony': (1e-4, 1e-6), 'loss_bspline': (2e-2, 1e-3),
            'loss_total': (2e-2, 1e-3)}
    for name in out:
        rtol, atol = tols[name]
        np.testing.assert_allclose(np.asarray(out[name]), np.asarray(ref[name]),
                                   rtol=rtol, atol=atol)

    print("KERNEL_OK")
</pallas_src>

<mosaic_0001>
module attributes {stable_mosaic.version = 11 : i64} {
  func.func @_fused_loss_kernel(%arg0: i32, %arg1: memref<2x64x8xf32, #tpu.memory_space<vmem>>, %arg2: memref<16x32xf32, #tpu.memory_space<vmem>>, %arg3: memref<32x128xf32, #tpu.memory_space<vmem>>, %arg4: memref<4x128xf32, #tpu.memory_space<vmem>>, %arg5: memref<4x128xf32, #tpu.memory_space<vmem>>, %arg6: memref<8x512xf32, #tpu.memory_space<vmem>>, %arg7: memref<2x8xf32, #tpu.memory_space<vmem>>, %arg8: memref<5xf32, #tpu.memory_space<smem>>) attributes {dimension_semantics = [#tpu.dimension_semantics<arbitrary>], iteration_bounds = array<i64: 1>, scalar_prefetch = 0 : i64, scratch_operands = 0 : i64, tpu.core_type = #tpu.core_type<tc>, window_params = [{pipeline_mode = #tpu.pipeline_mode<synchronous>, transform_indices = @transform_0, window_bounds = array<i64: 2, 64, 8>}, {pipeline_mode = #tpu.pipeline_mode<synchronous>, transform_indices = @transform_1, window_bounds = array<i64: 16, 32>}, {pipeline_mode = #tpu.pipeline_mode<synchronous>, transform_indices = @transform_2, window_bounds = array<i64: 32, 128>}, {pipeline_mode = #tpu.pipeline_mode<synchronous>, transform_indices = @transform_3, window_bounds = array<i64: 4, 128>}, {pipeline_mode = #tpu.pipeline_mode<synchronous>, transform_indices = @transform_4, window_bounds = array<i64: 4, 128>}, {pipeline_mode = #tpu.pipeline_mode<synchronous>, transform_indices = @transform_5, window_bounds = array<i64: 8, 512>}, {pipeline_mode = #tpu.pipeline_mode<synchronous>, transform_indices = @transform_6, window_bounds = array<i64: 2, 8>}, {transform_indices = @transform_7, window_bounds = array<i64: 5>}]} {
    %c0 = arith.constant 0 : index
    %c0_0 = arith.constant 0 : index
    %0 = vector.load %arg4[%c0, %c0_0] : memref<4x128xf32, #tpu.memory_space<vmem>>, vector<4x128xf32>
    %c0_1 = arith.constant 0 : index
    %c0_2 = arith.constant 0 : index
    %1 = vector.load %arg5[%c0_1, %c0_2] : memref<4x128xf32, #tpu.memory_space<vmem>>, vector<4x128xf32>
    %2 = arith.subf %0, %1 : vector<4x128xf32>
    %3 = arith.mulf %2, %2 : vector<4x128xf32>
    %4 = vector.shape_cast %3 : vector<4x128xf32> to vector<1x4x128xf32>
    %cst = arith.constant dense<0.000000e+00> : vector<1xf32>
    %5 = vector.multi_reduction <add>, %4, %cst [1, 2] : vector<1x4x128xf32> to vector<1xf32>
    %6 = vector.shape_cast %5 : vector<1xf32> to vector<1x1x1xf32>
    %7 = vector.extract %6[0, 0, 0] : f32 from vector<1x1x1xf32>
    %cst_3 = arith.constant 5.120000e+02 : f32
    %8 = arith.divf %7, %cst_3 : f32
    %cst_4 = arith.constant 1.000000e+00 : f32
    %9 = arith.mulf %cst_4, %8 : f32
    %c2 = arith.constant 2 : index
    %10 = memref.load %arg8[%c2] : memref<5xf32, #tpu.memory_space<smem>>
    memref.store %9, %arg8[%c2] : memref<5xf32, #tpu.memory_space<smem>>
    %c0_5 = arith.constant 0 : index
    %c0_6 = arith.constant 0 : index
    %11 = vector.load %arg6[%c0_5, %c0_6] : memref<8x512xf32, #tpu.memory_space<vmem>>, vector<8x512xf32>
    %cst_7 = arith.constant 5.000000e-01 : f32
    %12 = vector.broadcast %cst_7 : f32 to vector<8x512xf32>
    %13 = arith.cmpf ogt, %11, %12 : vector<8x512xf32>
    %14 = arith.extui %13 : vector<8x512xi1> to vector<8x512xi32>
    %15 = arith.sitofp %14 : vector<8x512xi32> to vector<8x512xf32>
    %16 = arith.mulf %11, %15 : vector<8x512xf32>
    %cst_8 = arith.constant dense<0.000000e+00> : vector<512xf32>
    %17 = vector.multi_reduction <add>, %16, %cst_8 [0] : vector<8x512xf32> to vector<512xf32>
    %18 = vector.shape_cast %17 : vector<512xf32> to vector<1x512xf32>
    %cst_9 = arith.constant 2.000000e+00 : f32
    %19 = vector.broadcast %cst_9 : f32 to vector<1x512xf32>
    %20 = arith.subf %18, %19 : vector<1x512xf32>
    %cst_10 = arith.constant 0.000000e+00 : f32
    %21 = vector.broadcast %cst_10 : f32 to vector<1x512xf32>
    %22 = arith.maximumf %20, %21 : vector<1x512xf32>
    %23 = vector.shape_cast %22 : vector<1x512xf32> to vector<1x1x512xf32>
    %cst_11 = arith.constant dense<0.000000e+00> : vector<1xf32>
    %24 = vector.multi_reduction <add>, %23, %cst_11 [1, 2] : vector<1x1x512xf32> to vector<1xf32>
    %25 = vector.shape_cast %24 : vector<1xf32> to vector<1x1x1xf32>
    %26 = vector.extract %25[0, 0, 0] : f32 from vector<1x1x1xf32>
    %cst_12 = arith.constant 5.120000e+02 : f32
    %27 = arith.divf %26, %cst_12 : f32
    %cst_13 = arith.constant 0.00999999977 : f32
    %28 = arith.mulf %cst_13, %27 : f32
    %c3 = arith.constant 3 : index
    %29 = memref.load %arg8[%c3] : memref<5xf32, #tpu.memory_space<smem>>
    memref.store %28, %arg8[%c3] : memref<5xf32, #tpu.memory_space<smem>>
    %c0_14 = arith.constant 0 : index
    %c0_15 = arith.constant 0 : index
    %30 = vector.load %arg7[%c0_14, %c0_15] : memref<2x8xf32, #tpu.memory_space<vmem>>, vector<2x8xf32>
    %31 = arith.negf %30 : vector<2x8xf32>
    %32 = math.exp %31 : vector<2x8xf32>
    %cst_16 = arith.constant 1.000000e+00 : f32
    %33 = vector.broadcast %cst_16 : f32 to vector<2x8xf32>
    %34 = arith.addf %33, %32 : vector<2x8xf32>
    %35 = arith.divf %33, %34 : vector<2x8xf32>
    %36 = vector.shape_cast %35 : vector<2x8xf32> to vector<1x2x8xf32>
    %cst_17 = arith.constant dense<0.000000e+00> : vector<1xf32>
    %37 = vector.multi_reduction <add>, %36, %cst_17 [1, 2] : vector<1x2x8xf32> to vector<1xf32>
    %38 = vector.shape_cast %37 : vector<1xf32> to vector<1x1x1xf32>
    %39 = vector.extract %38[0, 0, 0] : f32 from vector<1x1x1xf32>
    %40 = math.sqrt %39 : f32
    %cst_18 = arith.constant 1.000000e-03 : f32
    %41 = arith.mulf %cst_18, %40 : f32
    %c4 = arith.constant 4 : index
    %42 = memref.load %arg8[%c4] : memref<5xf32, #tpu.memory_space<smem>>
    memref.store %41, %arg8[%c4] : memref<5xf32, #tpu.memory_space<smem>>
    %c0_19 = arith.constant 0 : index
    %c0_20 = arith.constant 0 : index
    %43 = vector.load %arg2[%c0_19, %c0_20] : memref<16x32xf32, #tpu.memory_space<vmem>>, vector<16x32xf32>
    %c0_21 = arith.constant 0 : index
    %c0_22 = arith.constant 0 : index
    %44 = vector.load %arg3[%c0_21, %c0_22] : memref<32x128xf32, #tpu.memory_space<vmem>>, vector<32x128xf32>
    %cst_23 = arith.constant dense<0.000000e+00> : vector<16x128xf32>
    %45 = tpu.matmul %43, %44, %cst_23 {dimension_numbers = #tpu.dot_dimension_numbers<[1], [0], [0], [1], [0, 0, 1, 1], [], []>} : vector<16x32xf32>, vector<32x128xf32>, vector<16x128xf32> -> vector<16x128xf32>
    %c0_24 = arith.constant 0 : index
    %c0_25 = arith.constant 0 : index
    %c0_26 = arith.constant 0 : index
    %46 = vector.load %arg1[%c0_24, %c0_25, %c0_26] : memref<2x64x8xf32, #tpu.memory_space<vmem>>, vector<1x64x8xf32>
    %47 = vector.shape_cast %46 : vector<1x64x8xf32> to vector<64x8xf32>
    %48 = vector.extract_strided_slice %45 {offsets = [0, 0], sizes = [8, 128], strides = [1, 1]} : vector<16x128xf32> to vector<8x128xf32>
    %cst_27 = arith.constant dense<0.000000e+00> : vector<64x128xf32>
    %49 = tpu.matmul %47, %48, %cst_27 {dimension_numbers = #tpu.dot_dimension_numbers<[1], [0], [0], [1], [0, 0, 1, 1], [], []>} : vector<64x8xf32>, vector<8x128xf32>, vector<64x128xf32> -> vector<64x128xf32>
    %50 = arith.mulf %47, %47 : vector<64x8xf32>
    %cst_28 = arith.constant dense<0.000000e+00> : vector<64xf32>
    %51 = vector.multi_reduction <add>, %50, %cst_28 [1] : vector<64x8xf32> to vector<64xf32>
    %52 = vector.shape_cast %51 : vector<64xf32> to vector<64x1xf32>
    %53 = arith.mulf %48, %48 : vector<8x128xf32>
    %cst_29 = arith.constant dense<0.000000e+00> : vector<128xf32>
    %54 = vector.multi_reduction <add>, %53, %cst_29 [0] : vector<8x128xf32> to vector<128xf32>
    %55 = vector.shape_cast %54 : vector<128xf32> to vector<1x128xf32>
    %56 = vector.broadcast %52 : vector<64x1xf32> to vector<64x128xf32>
    %57 = vector.broadcast %55 : vector<1x128xf32> to vector<64x128xf32>
    %58 = arith.addf %56, %57 : vector<64x128xf32>
    %cst_30 = arith.constant 2.000000e+00 : f32
    %59 = vector.broadcast %cst_30 : f32 to vector<64x128xf32>
    %60 = arith.mulf %59, %49 : vector<64x128xf32>
    %61 = arith.subf %58, %60 : vector<64x128xf32>
    %cst_31 = arith.constant dense<0x7F800000> : vector<64xf32>
    %62 = vector.multi_reduction <minimumf>, %61, %cst_31 [1] : vector<64x128xf32> to vector<64xf32>
    %63 = vector.shape_cast %62 : vector<64xf32> to vector<64x1xf32>
    %cst_32 = arith.constant 0.000000e+00 : f32
    %64 = vector.broadcast %cst_32 : f32 to vector<64x1xf32>
    %65 = arith.maximumf %63, %64 : vector<64x1xf32>
    %cst_33 = arith.constant dense<0x7F800000> : vector<128xf32>
    %66 = vector.multi_reduction <minimumf>, %61, %cst_33 [0] : vector<64x128xf32> to vector<128xf32>
    %67 = vector.shape_cast %66 : vector<128xf32> to vector<1x128xf32>
    %cst_34 = arith.constant 0.000000e+00 : f32
    %68 = vector.broadcast %cst_34 : f32 to vector<1x128xf32>
    %69 = arith.maximumf %67, %68 : vector<1x128xf32>
    %70 = math.sqrt %65 : vector<64x1xf32>
    %71 = vector.shape_cast %70 : vector<64x1xf32> to vector<1x64x1xf32>
    %cst_35 = arith.constant dense<0.000000e+00> : vector<1xf32>
    %72 = vector.multi_reduction <add>, %71, %cst_35 [1, 2] : vector<1x64x1xf32> to vector<1xf32>
    %73 = vector.shape_cast %72 : vector<1xf32> to vector<1x1x1xf32>
    %74 = vector.extract %73[0, 0, 0] : f32 from vector<1x1x1xf32>
    %cst_36 = arith.constant 6.400000e+01 : f32
    %75 = arith.divf %74, %cst_36 : f32
    %76 = math.sqrt %69 : vector<1x128xf32>
    %77 = vector.shape_cast %76 : vector<1x128xf32> to vector<1x1x128xf32>
    %cst_37 = arith.constant dense<0.000000e+00> : vector<1xf32>
    %78 = vector.multi_reduction <add>, %77, %cst_37 [1, 2] : vector<1x1x128xf32> to vector<1xf32>
    %79 = vector.shape_cast %78 : vector<1xf32> to vector<1x1x1xf32>
    %80 = vector.extract %79[0, 0, 0] : f32 from vector<1x1x1xf32>
    %cst_38 = arith.constant 1.280000e+02 : f32
    %81 = arith.divf %80, %cst_38 : f32
    %82 = arith.addf %75, %81 : f32
    %cst_39 = arith.constant 1.000000e-01 : f32
    %83 = arith.mulf %cst_39, %82 : f32
    %c0_40 = arith.constant 0 : index
    %84 = memref.load %arg8[%c0_40] : memref<5xf32, #tpu.memory_space<smem>>
    memref.store %83, %arg8[%c0_40] : memref<5xf32, #tpu.memory_space<smem>>
    %c1 = arith.constant 1 : index
    %c0_41 = arith.constant 0 : index
    %c0_42 = arith.constant 0 : index
    %85 = vector.load %arg1[%c1, %c0_41, %c0_42] : memref<2x64x8xf32, #tpu.memory_space<vmem>>, vector<1x64x8xf32>
    %86 = vector.shape_cast %85 : vector<1x64x8xf32> to vector<64x8xf32>
    %87 = vector.extract_strided_slice %45 {offsets = [8, 0], sizes = [8, 128], strides = [1, 1]} : vector<16x128xf32> to vector<8x128xf32>
    %cst_43 = arith.constant dense<0.000000e+00> : vector<64x128xf32>
    %88 = tpu.matmul %86, %87, %cst_43 {dimension_numbers = #tpu.dot_dimension_numbers<[1], [0], [0], [1], [0, 0, 1, 1], [], []>} : vector<64x8xf32>, vector<8x128xf32>, vector<64x128xf32> -> vector<64x128xf32>
    %89 = arith.mulf %86, %86 : vector<64x8xf32>
    %cst_44 = arith.constant dense<0.000000e+00> : vector<64xf32>
    %90 = vector.multi_reduction <add>, %89, %cst_44 [1] : vector<64x8xf32> to vector<64xf32>
    %91 = vector.shape_cast %90 : vector<64xf32> to vector<64x1xf32>
    %92 = arith.mulf %87, %87 : vector<8x128xf32>
    %cst_45 = arith.constant dense<0.000000e+00> : vector<128xf32>
    %93 = vector.multi_reduction <add>, %92, %cst_45 [0] : vector<8x128xf32> to vector<128xf32>
    %94 = vector.shape_cast %93 : vector<128xf32> to vector<1x128xf32>
    %95 = vector.broadcast %91 : vector<64x1xf32> to vector<64x128xf32>
    %96 = vector.broadcast %94 : vector<1x128xf32> to vector<64x128xf32>
    %97 = arith.addf %95, %96 : vector<64x128xf32>
    %cst_46 = arith.constant 2.000000e+00 : f32
    %98 = vector.broadcast %cst_46 : f32 to vector<64x128xf32>
    %99 = arith.mulf %98, %88 : vector<64x128xf32>
    %100 = arith.subf %97, %99 : vector<64x128xf32>
    %cst_47 = arith.constant dense<0x7F800000> : vector<64xf32>
    %101 = vector.multi_reduction <minimumf>, %100, %cst_47 [1] : vector<64x128xf32> to vector<64xf32>
    %102 = vector.shape_cast %101 : vector<64xf32> to vector<64x1xf32>
    %cst_48 = arith.constant 0.000000e+00 : f32
    %103 = vector.broadcast %cst_48 : f32 to vector<64x1xf32>
    %104 = arith.maximumf %102, %103 : vector<64x1xf32>
    %cst_49 = arith.constant dense<0x7F800000> : vector<128xf32>
    %105 = vector.multi_reduction <minimumf>, %100, %cst_49 [0] : vector<64x128xf32> to vector<128xf32>
    %106 = vector.shape_cast %105 : vector<128xf32> to vector<1x128xf32>
    %cst_50 = arith.constant 0.000000e+00 : f32
    %107 = vector.broadcast %cst_50 : f32 to vector<1x128xf32>
    %108 = arith.maximumf %106, %107 : vector<1x128xf32>
    %109 = math.sqrt %104 : vector<64x1xf32>
    %110 = vector.shape_cast %109 : vector<64x1xf32> to vector<1x64x1xf32>
    %cst_51 = arith.constant dense<0.000000e+00> : vector<1xf32>
    %111 = vector.multi_reduction <add>, %110, %cst_51 [1, 2] : vector<1x64x1xf32> to vector<1xf32>
    %112 = vector.shape_cast %111 : vector<1xf32> to vector<1x1x1xf32>
    %113 = vector.extract %112[0, 0, 0] : f32 from vector<1x1x1xf32>
    %cst_52 = arith.constant 6.400000e+01 : f32
    %114 = arith.divf %113, %cst_52 : f32
    %115 = math.sqrt %108 : vector<1x128xf32>
    %116 = vector.shape_cast %115 : vector<1x128xf32> to vector<1x1x128xf32>
    %cst_53 = arith.constant dense<0.000000e+00> : vector<1xf32>
    %117 = vector.multi_reduction <add>, %116, %cst_53 [1, 2] : vector<1x1x128xf32> to vector<1xf32>
    %118 = vector.shape_cast %117 : vector<1xf32> to vector<1x1x1xf32>
    %119 = vector.extract %118[0, 0, 0] : f32 from vector<1x1x1xf32>
    %cst_54 = arith.constant 1.280000e+02 : f32
    %120 = arith.divf %119, %cst_54 : f32
    %121 = arith.addf %114, %120 : f32
    %cst_55 = arith.constant 1.000000e-01 : f32
    %122 = arith.mulf %cst_55, %121 : f32
    %c1_56 = arith.constant 1 : index
    %123 = memref.load %arg8[%c1_56] : memref<5xf32, #tpu.memory_space<smem>>
    memref.store %122, %arg8[%c1_56] : memref<5xf32, #tpu.memory_space<smem>>
    return
  }
  func.func @transform_0(%arg0: i32) -> (i32, i32, i32) {
    %c0_i32 = arith.constant 0 : i32
    %c0_i32_0 = arith.constant 0 : i32
    %c0_i32_1 = arith.constant 0 : i32
    %c0_i32_2 = arith.constant 0 : i32
    return %c0_i32, %c0_i32_0, %c0_i32_1 : i32, i32, i32
  }
  func.func @transform_1(%arg0: i32) -> (i32, i32) {
    %c0_i32 = arith.constant 0 : i32
    %c0_i32_0 = arith.constant 0 : i32
    %c0_i32_1 = arith.constant 0 : i32
    return %c0_i32, %c0_i32_0 : i32, i32
  }
  func.func @transform_2(%arg0: i32) -> (i32, i32) {
    %c0_i32 = arith.constant 0 : i32
    %c0_i32_0 = arith.constant 0 : i32
    %c0_i32_1 = arith.constant 0 : i32
    return %c0_i32, %c0_i32_0 : i32, i32
  }
  func.func @transform_3(%arg0: i32) -> (i32, i32) {
    %c0_i32 = arith.constant 0 : i32
    %c0_i32_0 = arith.constant 0 : i32
    %c0_i32_1 = arith.constant 0 : i32
    return %c0_i32, %c0_i32_0 : i32, i32
  }
  func.func @transform_4(%arg0: i32) -> (i32, i32) {
    %c0_i32 = arith.constant 0 : i32
    %c0_i32_0 = arith.constant 0 : i32
    %c0_i32_1 = arith.constant 0 : i32
    return %c0_i32, %c0_i32_0 : i32, i32
  }
  func.func @transform_5(%arg0: i32) -> (i32, i32) {
    %c0_i32 = arith.constant 0 : i32
    %c0_i32_0 = arith.constant 0 : i32
    %c0_i32_1 = arith.constant 0 : i32
    return %c0_i32, %c0_i32_0 : i32, i32
  }
  func.func @transform_6(%arg0: i32) -> (i32, i32) {
    %c0_i32 = arith.constant 0 : i32
    %c0_i32_0 = arith.constant 0 : i32
    %c0_i32_1 = arith.constant 0 : i32
    return %c0_i32, %c0_i32_0 : i32, i32
  }
  func.func @transform_7(%arg0: i32) -> i32 {
    %c0_i32 = arith.constant 0 : i32
    %c0_i32_0 = arith.constant 0 : i32
    return %c0_i32 : i32
  }
}

</mosaic_0001>

<bundles_post_ra>
// kernel: loss_forward.1
= control target key start
LH: loop header
LB: loop body
LE: loop exit
PB: predicated region body
PF: predicated region fallthrough
CT: control target
= control target key end

     0   :  { %vm226_vm0 = vcmask 64512   ;;  %vm188_vm1 = vcmask 261120   ;;  %s1615_s0 = inlined_call_operand.vmem [shape: f32[2,64,8], index: 0, kind: input, shape index: {}]   ;;  %s1616_s1 = inlined_call_operand.vmem [shape: f32[16,32], index: 1, kind: input, shape index: {}]   ;;  %s1617_s2 = inlined_call_operand.vmem [shape: f32[32,128], index: 2, kind: input, shape index: {}]   ;;  %s1618_s3 = inlined_call_operand.vmem [shape: f32[4,128], index: 3, kind: input, shape index: {}]   ;;  %s1619_s4 = inlined_call_operand.vmem [shape: f32[4,128], index: 4, kind: input, shape index: {}]   ;;  %s1620_s5 = inlined_call_operand.vmem [shape: f32[8,512], index: 5, kind: input, shape index: {}]   ;;  %s1621_s6 = inlined_call_operand.vmem [shape: f32[2,8], index: 6, kind: input, shape index: {}]   ;;  %s1622_s7 = inlined_call_operand.vmem [shape: f32[5], index: 7, kind: output, shape index: {}]  }
   0x1   :  { %v187_v0 = vld [vmem:[%s1617_s2 + $0x18] sm:$0xff]  ;;  %v186_v1 = vld [vmem:[%s1617_s2 + $0x10] sm:$0xff]  ;;  %v1103_v4 = vld [vmem:[%s1615_s0] sm:$0xff] }
   0x2   :  { %v1096_v2 = vld [vmem:[%s1615_s0 + $0x10] sm:$0xff]  ;;  %207 = vmatpush.msra.mxu0 %v187_v0  ;;  %947 = vmatpush.msra.mxu3 %v187_v0  ;;  %v1108_v5 = vld [vmem:[%s1615_s0 + $0x40] sm:$0xff]  ;;  %v292_v6 = vmul.f32 %v1103_v4, %v1103_v4  ;;  %v185_v7 = vld [vmem:[%s1617_s2 + $0x8] sm:$0xff] }
   0x3   :  { %v294_v3 = vmul.f32 %v1096_v2, %v1096_v2  ;;  %v632_v8 = vmul.f32 %v1108_v5, %v1108_v5  ;;  %v1121_v10 = vld [vmem:[%s1615_s0 + $0x50] sm:$0xff]  ;;  %v1126_v11 = vld [vmem:[%s1615_s0 + $0x8] sm:$0xff]  ;;  %v184_v14 = vld [vmem:[%s1617_s2] sm:$0xff] }
   0x4   :  { %208 = vmatpush.msra.mxu0 %v186_v1  ;;  %948 = vmatpush.msra.mxu3 %v186_v1  ;;  %v300_v12 = vsel %vm226_vm0, %v292_v6, 0.0  ;;  %v1136_v15 = vld [vmem:[%s1615_s0 + $0x48] sm:$0xff]  ;;  %v182_v16 = vld [vmem:[%s1616_s1] sm:$0xff]  ;;  %v634_v17 = vmul.f32 %v1121_v10, %v1121_v10  ;;  %v293_v19 = vmul.f32 %v1126_v11, %v1126_v11 }
   0x5   :  { %v306_v9 = vsel %vm226_vm0, %v294_v3, 0.0  ;;  %v640_v13 = vsel %vm226_vm0, %v632_v8, 0.0  ;;  %301 = vadd.xlane.f32.xlu0 %v300_v12  ;;  %v183_v18 = vld [vmem:[%s1616_s1 + $0x8] sm:$0xff]  ;;  %v633_v20 = vmul.f32 %v1136_v15, %v1136_v15 }
   0x6   :  { %307 = vadd.xlane.f32.xlu2 %v306_v9  ;;  %209 = vmatpush.msra.mxu0 %v185_v7 }
   0x7   :  { %949 = vmatpush.msra.mxu3 %v185_v7  ;;  %641 = vadd.xlane.f32.xlu1 %v640_v13 }
   0x8   :  { %210 = vmatpush.msra.mxu0 %v184_v14 }
   0x9   :  { %12 = vsyncpa [#allocation3], 0  ;;  %950 = vmatpush.msra.mxu3 %v184_v14  ;;  %921 = vmatmul.msk.f32.vlgmr.msra.gmra.mxu0 %vm188_vm1, %v182_v16  ;;  %v646_v21 = vsel %vm226_vm0, %v634_v17, 0.0  ;;  %v303_v22 = vsel %vm226_vm0, %v293_v19, 0.0  ;;  %v1155_v23 = vld [vmem:[%s1615_s0 + $0x20] sm:$0xff]  ;;  %v643_v24 = vsel %vm226_vm0, %v633_v20, 0.0 }
   0xa   :  { %922 = vmatmul.msk.f32.vlgmr.msra.gmra.mxu3 %vm188_vm1, %v183_v18  ;;  %v1161_v25 = vld [vmem:[%s1615_s0 + $0x18] sm:$0xff]  ;;  %v296_v27 = vmul.f32 %v1155_v23, %v1155_v23  ;;  %v1175_v32 = vld [vmem:[%s1615_s0 + $0x68] sm:$0xff]  ;;  %v1181_v34 = vld [vmem:[%s1615_s0 + $0x60] sm:$0xff]  ;;  %v1042_v62 = vmov 0.0   ;;  %vm31_vm6 = vcmask 1043456   ;;  %vm105_vm8 = vcmask 1040384  }
   0xb   :  { %v934_v26 = vld [vmem:[%s1615_s0 + $0x58] sm:$0xff]  ;;  %v295_v28 = vmul.f32 %v1161_v25, %v1161_v25  ;;  %v223_v35 = vld [vmem:[%s1615_s0 + $0x28] sm:$0xff]  ;;  %v637_v36 = vmul.f32 %v1175_v32, %v1175_v32  ;;  %v636_v37 = vmul.f32 %v1181_v34, %v1181_v34  ;;  %v224_v43 = vld [vmem:[%s1615_s0 + $0x30] sm:$0xff]  ;;  %vm154_vm12 = vcmask 58368   ;;  %s902_s25 = sshll.u32 %s1622_s7, 4  ;;  %s1046_s26 = smov [#allocation2]   ;;  %s903_s25 = int_to_ptr.vmem [resolvable:$true] %s902_s25 }
   0xc   :  { %v635_v29 = vmul.f32 %v934_v26, %v934_v26  ;;  %v312_v30 = vsel %vm226_vm0, %v296_v27, 0.0  ;;  %v297_v38 = vmul.f32 %v223_v35, %v223_v35  ;;  %v1195_v41 = vld [vmem:[%s1615_s0 + $0x38] sm:$0xff]  ;;  %v1204_v44 = vld [vmem:[%s1615_s0 + $0x70] sm:$0xff]  ;;  %v298_v46 = vmul.f32 %v224_v43, %v224_v43  ;;  %v134_v56 = vld [vmem:[%s1621_s6] sm:$0x3] }
   0xd   :  { %304 = vadd.xlane.f32.xlu0 %v303_v22  ;;  %v309_v31 = vsel %vm226_vm0, %v295_v28, 0.0  ;;  %v655_v39 = vsel %vm226_vm0, %v637_v36, 0.0  ;;  %v652_v40 = vsel %vm226_vm0, %v636_v37, 0.0  ;;  %v299_v45 = vmul.f32 %v1195_v41, %v1195_v41  ;;  %v1216_v51 = vld [vmem:[%s1615_s0 + $0x78] sm:$0xff]  ;;  %v53_v57 = vld [vmem:[%s1620_s5] sm:$0xff]  ;;  %v54_v58 = vld [vmem:[%s1620_s5 + $0x8] sm:$0xff] }
   0xe   :  { %647 = vadd.xlane.f32.xlu2 %v646_v21  ;;  %v649_v33 = vsel %vm226_vm0, %v635_v29, 0.0  ;;  %v315_v42 = vsel %vm226_vm0, %v297_v38, 0.0  ;;  %v638_v47 = vmul.f32 %v1204_v44, %v1204_v44  ;;  %v318_v49 = vsel %vm226_vm0, %v298_v46, 0.0  ;;  %v55_v60 = vld [vmem:[%s1620_s5 + $0x10] sm:$0xff]  ;;  %v56_v61 = vld [vmem:[%s1620_s5 + $0x18] sm:$0xff] }
   0xf   :  { %644 = vadd.xlane.f32.xlu1 %v643_v24  ;;  %v321_v48 = vsel %vm226_vm0, %v299_v45, 0.0  ;;  %v639_v52 = vmul.f32 %v1216_v51, %v1216_v51  ;;  %v920_v59 = vmul.f32 -1.442695, %v134_v56  ;;  %vm57_vm2 = vcmp.gt.f32.partialorder %v53_v57, 0.5  ;;  %v27_v8 = vld [vmem:[%s1618_s3] sm:$0xf] }
  0x10   :  { %v658_v50 = vsel %vm226_vm0, %v638_v47, 0.0  ;;  %vm58_vm3 = vcmp.gt.f32.partialorder %v54_v58, 0.5  ;;  %vm59_vm4 = vcmp.gt.f32.partialorder %v55_v60, 0.5  ;;  %vm60_vm5 = vcmp.gt.f32.partialorder %v56_v61, 0.5  ;;  %v28_v9 = vld [vmem:[%s1619_s4] sm:$0xf] }
  0x11   :  { %v661_v53 = vsel %vm226_vm0, %v639_v52, 0.0  ;;  %980 = vpow2.f32 %v920_v59  ;;  %v912_v63 = vsel %vm57_vm2, 1.0, %v1042_v62  ;;  %v913_v0 = vsel %vm58_vm3, 1.0, %v1042_v62 }
  0x12   :  { %v914_v1 = vsel %vm59_vm4, 1.0, %v1042_v62  ;;  %v915_v3 = vsel %vm60_vm5, 1.0, %v1042_v62  ;;  %v29_v17 = vsub.f32 %v27_v8, %v28_v9 }
  0x13   :  { %v71_v6 = vmul.f32 %v914_v1, %v55_v60  ;;  %v72_v7 = vmul.f32 %v915_v3, %v56_v61 }
  0x15   :  { %310 = vadd.xlane.f32.xlu0 %v309_v31  ;;  %v85_v13 = vrot.slane %v71_v6, 4  ;;  %v91_v14 = vrot.slane %v72_v7, 4 }
  0x16   :  { %313 = vadd.xlane.f32.xlu2 %v312_v30 }
  0x17   :  { %650 = vadd.xlane.f32.xlu1 %v649_v33  ;;  %v981_v18 = vpop.eup %980  ;;  %v86_v20 = vadd.f32 %v85_v13, %v71_v6  ;;  %v92_v27 = vadd.f32 %v91_v14, %v72_v7 }
  0x18   :  { %v138_v21 = vadd.f32 1.0, %v981_v18 }
  0x19   :  { %v93_v33 = vrot.slane %v92_v27, 2 }
  0x1a   :  { %982 = vrcp.f32 %v138_v21  ;;  %vm144_vm7 = vweird.f32 %v138_v21  ;;  %v148_v47 = vand.u32 2147483647, %v138_v21 }
  0x1b   :  { %v94_v37 = vadd.f32 %v93_v33, %v92_v27 }
  0x1c   :  { %vm149_vm11 = vcmp.eq.f32.partialorder %v148_v47, 8.507059e+37 }
  0x1d   :  { %653 = vadd.xlane.f32.xlu0 %v652_v40 }
  0x1e   :  { %656 = vadd.xlane.f32.xlu2 %v655_v39 }
  0x1f   :  { %316 = vadd.xlane.f32.xlu1 %v315_v42  ;;  %v95_v42 = vrot.slane %v94_v37, 1 }
  0x20   :  { %v983_v38 = vpop.eup %982 }
  0x21   :  { %vm145_vm9 = vweird.f32 %v983_v38 }
  0x22   :  { %vm146_vm10 = vmor %vm144_vm7, %vm145_vm9  ;;  %vm489_vm9 = vcmask 7168  }
  0x25   :  { %319 = vadd.xlane.f32.xlu0 %v318_v49 }
  0x26   :  { %322 = vadd.xlane.f32.xlu2 %v321_v48  ;;  %v96_v48 = vadd.f32 %v95_v42, %v94_v37 }
  0x27   :  { %659 = vadd.xlane.f32.xlu1 %v658_v50 }
  0x2d   :  { %662 = vadd.xlane.f32.xlu0 %v661_v53  ;;  %v919_v53 = vadd.f32 -2.0, %v96_v48 }
  0x2f   :  { %v104_v61 = vmax.f32 %v919_v53, 0.0 }
  0x78   :  { %v302_v8 = vpop.xlane.xlu0 %301 }
  0x79   :  { %v1288_v14 = vpop.xlane.xlu2 %307 }
  0x80   :  { %v305_v18 = vpop.xlane.xlu0 %304 }
  0x86   :  { %v1221_v54 = vpop.f32.mrf.mxu0 }
  0x87   :  { %266 = vmatpush.msra.mxu1 %v1221_v54  ;;  %951 = vmatpush.msrb.mxu3 %v1221_v54 }
  0x88   :  { %923 = vmatmul.msk.f32.vlgmr.msra.gmra.mxu1 %vm226_vm0, %v1103_v4  ;;  %928 = vmatmul.msk.f32.vlgmr.msrb.gmra.mxu3 %vm226_vm0, %v223_v35  ;;  %v69_v4 = vmul.f32 %v912_v63, %v53_v57 }
  0x8d   :  { %v1228_v55 = vpop.f32.mrf.mxu3 }
  0x8e   :  { %606 = vmatpush.msrb.mxu0 %v1228_v55  ;;  %952 = vmatpush.msra.mxu2 %v1228_v55  ;;  %v664_v7 = vmul.f32 %v1228_v55, %v1228_v55  ;;  %v311_v55 = vpop.xlane.xlu0 %310 }
  0x8f   :  { %939 = vmatmul.msk.f32.vlgmr.msrb.gmra.mxu0 %vm226_vm0, %v1108_v5  ;;  %942 = vmatmul.msk.f32.vlgmr.msra.gmra.mxu2 %vm226_vm0, %v934_v26  ;;  %v70_v5 = vmul.f32 %v913_v0, %v54_v58  ;;  %v87_v26 = vrot.slane %v86_v20, 2 }
  0x90   :  { %924 = vmatmul.msk.f32.gmra.mxu1 %vm226_vm0, %v1126_v11  ;;  %929 = vmatmul.msk.f32.gmra.mxu3 %vm226_vm0, %v224_v43  ;;  %v73_v11 = vrot.slane %v69_v4, 4  ;;  %v150_v43 = vand.u32 2147483648, %v138_v21 }
  0x91   :  { %v79_v12 = vrot.slane %v70_v5, 4  ;;  %v88_v30 = vadd.f32 %v87_v26, %v86_v20 }
  0x92   :  { %v74_v16 = vadd.f32 %v73_v11, %v69_v4  ;;  %v151_v56 = vor.u32 1.1754944e-38, %v150_v43  ;;  %v665_v11 = vrot.slane %v664_v7, 4 }
  0x93   :  { %v80_v19 = vadd.f32 %v79_v12, %v70_v5  ;;  %v89_v35 = vrot.slane %v88_v30, 1  ;;  %v642_v5 = vpop.xlane.xlu1 %641 }
  0x94   :  { %v75_v22 = vrot.slane %v74_v16, 2 }
  0x95   :  { %v81_v24 = vrot.slane %v80_v19, 2  ;;  %v90_v40 = vadd.f32 %v89_v35, %v88_v30 }
  0x96   :  { %v76_v28 = vadd.f32 %v75_v22, %v74_v16  ;;  %v666_v16 = vadd.f32 %v665_v11, %v664_v7  ;;  %v648_v22 = vpop.xlane.xlu2 %647 }
  0x97   :  { %940 = vmatmul.msk.f32.gmra.mxu0 %vm226_vm0, %v1136_v15  ;;  %943 = vmatmul.msk.f32.gmra.mxu2 %vm226_vm0, %v1181_v34  ;;  %v30_v15 = vmul.f32 %v29_v17, %v29_v17  ;;  %v82_v29 = vadd.f32 %v81_v24, %v80_v19  ;;  %v918_v46 = vadd.f32 -2.0, %v90_v40 }
  0x98   :  { %925 = vmatmul.msk.f32.gmra.mxu1 %vm226_vm0, %v1096_v2  ;;  %930 = vmatmul.msk.f32.gmra.mxu3 %vm226_vm0, %v1195_v41  ;;  %v77_v31 = vrot.slane %v76_v28, 1  ;;  %v140_v41 = vmul.f32 %v983_v38, %v138_v21  ;;  %v667_v19 = vrot.slane %v666_v16, 2 }
  0x99   :  { %v32_v34 = vsel %vm31_vm6, %v30_v15, 0.0  ;;  %v83_v2 = vrot.slane %v82_v29, 1  ;;  %v103_v50 = vmax.f32 %v918_v46, 0.0 }
  0x9a   :  { %v78_v36 = vadd.f32 %v77_v31, %v76_v28  ;;  %33 = vadd.xlane.f32.xlu0 %v32_v34  ;;  %v668_v21 = vadd.f32 %v667_v19, %v666_v16 }
  0x9b   :  { %v84_v39 = vadd.f32 %v83_v2, %v82_v29  ;;  %v109_v59 = vsel %vm105_vm8, %v103_v50, 0.0  ;;  %v645_v13 = vpop.xlane.xlu1 %644 }
  0x9c   :  { %v669_v24 = vrot.slane %v668_v21, 1 }
  0x9d   :  { %v917_v45 = vadd.f32 -2.0, %v84_v39 }
  0x9e   :  { %v1295_v29 = vadd.f32 %v669_v24, %v668_v21  ;;  %v314_v35 = vpop.xlane.xlu2 %313 }
  0x9f   :  { %941 = vmatmul.msk.f32.gmra.mxu0 %vm226_vm0, %v1121_v10  ;;  %944 = vmatmul.msk.f32.gmra.mxu2 %vm226_vm0, %v1175_v32  ;;  %v916_v10 = vadd.f32 -2.0, %v78_v36  ;;  %v141_v32 = vsub.f32 1.0, %v140_v41  ;;  %v654_v41 = vpop.xlane.xlu0 %653 }
  0xa0   :  { %926 = vmatmul.msk.f32.gmra.mxu1 %vm226_vm0, %v1161_v25  ;;  %v102_v25 = vmax.f32 %v917_v45, 0.0  ;;  %v672_v48 = vadd.f32 %v1295_v29, %v645_v13 }
  0xa1   :  { %v101_v49 = vmax.f32 %v916_v10, 0.0  ;;  %v142_v52 = vmul.f32 %v983_v38, %v141_v32 }
  0xa2   :  { %v107_v58 = vsel %vm105_vm8, %v102_v25, 0.0 }
  0xa3   :  { %v106_v57 = vsel %vm105_vm8, %v101_v49, 0.0  ;;  %v143_v60 = vadd.f32 %v983_v38, %v142_v52  ;;  %v651_v20 = vpop.xlane.xlu1 %650 }
  0xa4   :  { %v108_v62 = vadd.f32 %v107_v58, %v106_v57  ;;  %v675_v57 = vadd.f32 %v1295_v29, %v654_v41 }
  0xa5   :  { %v147_v63 = vsel %vm146_vm10, %v983_v38, %v143_v60  ;;  %v671_v38 = vadd.f32 %v1295_v29, %v642_v5 }
  0xa6   :  { %v110_v0 = vadd.f32 %v109_v59, %v108_v62  ;;  %v152_v1 = vsel %vm149_vm11, %v151_v56, %v147_v63  ;;  %v657_v25 = vpop.xlane.xlu2 %656 }
  0xa7   :  { %945 = vmatmul.msk.f32.gmra.mxu2 %vm226_vm0, %v1204_v44  ;;  %v111_v44 = vsel %vm105_vm8, %v104_v61, 0.0  ;;  %v155_v3 = vsel %vm154_vm12, %v152_v1, 0.0  ;;  %v320_v52 = vpop.xlane.xlu0 %319  ;;  %v674_v61 = vadd.f32 %v1295_v29, %v651_v20  ;;  %v676_v16 = vadd.f32 %v1295_v29, %v657_v25 }
  0xa8   :  { %927 = vmatmul.msk.f32.gmra.mxu1 %vm226_vm0, %v1155_v23  ;;  %v112_v4 = vadd.f32 %v111_v44, %v110_v0  ;;  %156 = vadd.xlane.f32.xlu2 %v155_v3  ;;  %v324_v23 = vmul.f32 %v1221_v54, %v1221_v54  ;;  %v673_v44 = vadd.f32 %v1295_v29, %v648_v22 }
  0xaa   :  { %113 = vadd.xlane.f32.xlu1 %v112_v4  ;;  %v325_v6 = vrot.slane %v324_v23, 4 }
  0xab   :  { %v317_v30 = vpop.xlane.xlu1 %316 }
  0xac   :  { %v326_v9 = vadd.f32 %v325_v6, %v324_v23 }
  0xae   :  { %v327_v12 = vrot.slane %v326_v9, 2 }
  0xaf   :  { %946 = vmatmul.msk.f32.gmra.mxu2 %vm226_vm0, %v1216_v51 }
  0xb0   :  { %v328_v17 = vadd.f32 %v327_v12, %v326_v9 }
  0xb2   :  { %v329_v51 = vrot.slane %v328_v17, 1 }
  0xb4   :  { %v1290_v54 = vadd.f32 %v329_v51, %v328_v17 }
  0xb6   :  { %v331_v15 = vadd.f32 %v1290_v54, %v302_v8  ;;  %v336_v33 = vadd.f32 %v1290_v54, %v317_v30  ;;  %v332_v45 = vadd.f32 %v1290_v54, %v305_v18  ;;  %v337_v62 = vadd.f32 %v1290_v54, %v320_v52  ;;  %v323_v8 = vpop.xlane.xlu2 %322 }
  0xb7   :  { %v334_v9 = vadd.f32 %v1290_v54, %v311_v55  ;;  %v338_v18 = vadd.f32 %v1290_v54, %v323_v8  ;;  %v333_v19 = vadd.f32 %v1290_v54, %v1288_v14  ;;  %v335_v22 = vadd.f32 %v1290_v54, %v314_v35 }
 0x105   :  { %v268_v26 = vpop.f32.mrf.mxu1 }
 0x106   :  { %v339_v27 = vmul.f32 2.0, %v268_v26 }
 0x108   :  { %v1293_v28 = vsub.f32 %v331_v15, %v339_v27  ;;  %v660_v15 = vpop.xlane.xlu1 %659 }
 0x10a   :  { %355 = vmin.xlane.f32.xlu1 %v1293_v28 }
 0x10b   :  { %v283_v31 = vpop.f32.mrf.mxu3 }
 0x10c   :  { %v344_v34 = vmul.f32 2.0, %v283_v31  ;;  %v608_v2 = vpop.f32.mrf.mxu0 }
 0x10d   :  { %v679_v36 = vmul.f32 2.0, %v608_v2  ;;  %v271_v37 = vpop.f32.mrf.mxu1 }
 0x10e   :  { %v1300_v39 = vsub.f32 %v336_v33, %v344_v34  ;;  %v340_v42 = vmul.f32 2.0, %v271_v37  ;;  %v677_v37 = vadd.f32 %v1295_v29, %v660_v15 }
 0x10f   :  { %v687_v40 = vsub.f32 %v671_v38, %v679_v36 }
 0x110   :  { %365 = vmin.xlane.f32.xlu2 %v1300_v39  ;;  %v348_v49 = vsub.f32 %v332_v45, %v340_v42 }
 0x111   :  { %695 = vmin.xlane.f32.xlu0 %v687_v40 }
 0x112   :  { %v617_v43 = vpop.f32.mrf.mxu2  ;;  %v380_v34 = vmin.f32 %v348_v49, %v1300_v39 }
 0x113   :  { %v286_v46 = vpop.f32.mrf.mxu3  ;;  %v682_v53 = vmul.f32 2.0, %v617_v43 }
 0x114   :  { %v611_v10 = vpop.f32.mrf.mxu0  ;;  %v345_v58 = vmul.f32 2.0, %v286_v46 }
 0x115   :  { %v680_v32 = vmul.f32 2.0, %v611_v10  ;;  %v274_v47 = vpop.f32.mrf.mxu1  ;;  %v1309_v3 = vsub.f32 %v674_v61, %v682_v53  ;;  %v1043_v53 = vmov 512.0  }
 0x116   :  { %v353_v23 = vsub.f32 %v337_v62, %v345_v58  ;;  %v341_v11 = vmul.f32 2.0, %v274_v47  ;;  %984 = vrcp.f32 %v1043_v53 }
 0x117   :  { %v688_v50 = vsub.f32 %v672_v48, %v680_v32 }
 0x118   :  { %357 = vmin.xlane.f32.xlu2 %v348_v49  ;;  %v349_v26 = vsub.f32 %v333_v19, %v341_v11 }
 0x119   :  { %697 = vmin.xlane.f32.xlu1 %v688_v50 }
 0x11a   :  { %v620_v56 = vpop.f32.mrf.mxu2  ;;  %v381_v2 = vmin.f32 %v349_v26, %v353_v23 }
 0x11b   :  { %v683_v59 = vmul.f32 2.0, %v620_v56  ;;  %v289_v4 = vpop.f32.mrf.mxu3  ;;  %v157_v47 = vpop.xlane.xlu2 %156 }
 0x11c   :  { %v614_v60 = vpop.f32.mrf.mxu0  ;;  %v346_v12 = vmul.f32 2.0, %v289_v4  ;;  %v158_v25 = vrot.slane %v157_v47, 4  ;;  %v985_v4 = vpop.eup %984 }
 0x11d   :  { %v681_v63 = vmul.f32 2.0, %v614_v60  ;;  %v277_v0 = vpop.f32.mrf.mxu1  ;;  %v691_v1 = vsub.f32 %v675_v57, %v683_v59  ;;  %v114_v48 = vpop.xlane.xlu1 %113  ;;  %v43_v8 = vmul.f32 512.0, %v985_v4  ;;  %vm47_vm13 = vweird.f32 %v985_v4 }
 0x11e   :  { %v342_v7 = vmul.f32 2.0, %v277_v0  ;;  %v354_v27 = vsub.f32 %v338_v18, %v346_v12  ;;  %v159_v59 = vadd.f32 %v158_v25, %v157_v47 }
 0x11f   :  { %v1311_v5 = vsub.f32 %v673_v44, %v681_v63  ;;  %v719_v6 = vmin.f32 %v687_v40, %v691_v1  ;;  %v663_v40 = vpop.xlane.xlu0 %662  ;;  %v44_v11 = vsub.f32 1.0, %v43_v8 }
 0x120   :  { %701 = vmin.xlane.f32.xlu2 %v1309_v3  ;;  %v350_v51 = vsub.f32 %v334_v9, %v342_v7  ;;  %v678_v46 = vadd.f32 %v1295_v29, %v663_v40  ;;  %v160_v29 = vrot.slane %v159_v59, 2 }
 0x121   :  { %367 = vmin.xlane.f32.xlu1 %v353_v23  ;;  %699 = vmin.xlane.f32.xlu0 %v1311_v5 }
 0x122   :  { %v623_v13 = vpop.f32.mrf.mxu2  ;;  %v382_v31 = vmin.f32 %v350_v51, %v354_v27  ;;  %v161_v9 = vadd.f32 %v160_v29, %v159_v59 }
 0x123   :  { %v684_v17 = vmul.f32 2.0, %v623_v13 }
 0x124   :  { %v384_v38 = vmin.f32 %v381_v2, %v382_v31  ;;  %v162_v13 = vrot.slane %v161_v9, 1 }
 0x125   :  { %v280_v20 = vpop.f32.mrf.mxu1  ;;  %v692_v21 = vsub.f32 %v676_v16, %v684_v17  ;;  %v45_v17 = vmul.f32 %v985_v4, %v44_v11 }
 0x126   :  { %v343_v24 = vmul.f32 2.0, %v280_v20  ;;  %v163_v20 = vadd.f32 %v162_v13, %v161_v9 }
 0x127   :  { %v720_v55 = vmin.f32 %v688_v50, %v692_v21  ;;  %v115_v50 = vrot.slane %v114_v48, 4  ;;  %v34_v52 = vpop.xlane.xlu0 %33  ;;  %v46_v18 = vadd.f32 %v985_v4, %v45_v17 }
 0x128   :  { %359 = vmin.xlane.f32.xlu2 %v349_v26  ;;  %v351_v30 = vsub.f32 %v335_v22, %v343_v24  ;;  %v35_v57 = vrot.slane %v34_v52, 4 }
 0x129   :  { %703 = vmin.xlane.f32.xlu1 %v691_v1  ;;  %v723_v33 = vmin.f32 %v719_v6, %v720_v55  ;;  %705 = vmin.xlane.f32.xlu0 %v692_v21  ;;  %v116_v60 = vadd.f32 %v115_v50, %v114_v48  ;;  %v48_v22 = vsel %vm47_vm13, %v985_v4, %v46_v18 }
 0x12a   :  { %v626_v14 = vpop.f32.mrf.mxu2  ;;  %v379_v36 = vmin.f32 %v1293_v28, %v351_v30  ;;  %v36_v62 = vadd.f32 %v35_v57, %v34_v52 }
 0x12b   :  { %v685_v54 = vmul.f32 2.0, %v626_v14  ;;  %v117_v0 = vrot.slane %v116_v60, 2 }
 0x12c   :  { %v383_v35 = vmin.f32 %v379_v36, %v380_v34  ;;  %v37_v1 = vrot.slane %v36_v62, 2 }
 0x12d   :  { %v693_v41 = vsub.f32 %v677_v37, %v685_v54 }
 0x12e   :  { %v385_v42 = vmin.f32 %v383_v35, %v384_v38  ;;  %v38_v7 = vadd.f32 %v37_v1, %v36_v62 }
 0x12f   :  { %v721_v43 = vmin.f32 %v1311_v5, %v693_v41  ;;  %v118_v5 = vadd.f32 %v117_v0, %v116_v60 }
 0x130   :  { %707 = vmin.xlane.f32.xlu2 %v693_v41  ;;  %v386_v10 = vrot.slane %v385_v42, 4 }
 0x131   :  { %361 = vmin.xlane.f32.xlu1 %v350_v51  ;;  %363 = vmin.xlane.f32.xlu0 %v351_v30  ;;  %v119_v12 = vrot.slane %v118_v5, 1 }
 0x132   :  { %v629_v45 = vpop.f32.mrf.mxu2  ;;  %v387_v39 = vmin.f32 %v385_v42, %v386_v10 }
 0x133   :  { %v686_v32 = vmul.f32 2.0, %v629_v45  ;;  %v120_v19 = vadd.f32 %v119_v12, %v118_v5 }
 0x134   :  { %v388_v28 = vrot.slane %v387_v39, 2 }
 0x135   :  { %v694_v49 = vsub.f32 %v678_v46, %v686_v32 }
 0x136   :  { %v389_v56 = vmin.f32 %v387_v39, %v388_v28 }
 0x137   :  { %v722_v58 = vmin.f32 %v1309_v3, %v694_v49  ;;  %v39_v3 = vrot.slane %v38_v7, 1 }
 0x138   :  { %v390_v61 = vrot.slane %v389_v56, 1 }
 0x139   :  { %v724_v63 = vmin.f32 %v721_v43, %v722_v58  ;;  %709 = vmin.xlane.f32.xlu1 %v694_v49  ;;  %369 = vmin.xlane.f32.xlu0 %v354_v27  ;;  %v40_v16 = vadd.f32 %v39_v3, %v38_v7 }
 0x13a   :  { %v391_v44 = vmin.f32 %v389_v56, %v390_v61 }
 0x13b   :  { %v725_v23 = vmin.f32 %v723_v33, %v724_v63  ;;  %953 = vpush %v40_v16 }
 0x13c   :  { %v392_v6 = vmax.f32 %v391_v44, 0.0  ;;  %955 = vpush %v48_v22 }
 0x13d   :  { %957 = vpush %v120_v19  ;;  %v726_v2 = vrot.slane %v725_v23, 4 }
 0x13e   :  { %986 = vrsqrt.f32 %v392_v6  ;;  %959 = vpush %v163_v20  ;;  %vm530_vm14 = vcmp.eq.f32.partialorder %v392_v6, inf  ;;  %v533_v30 = vand.u32 2147483648, %v392_v6  ;;  %vm532_vm15 = vcmp.eq.f32.partialorder %v392_v6, 0.0 }
 0x13f   :  { %v727_v14 = vmin.f32 %v725_v23, %v726_v2 }
 0x141   :  { %v728_v36 = vrot.slane %v727_v14, 2 }
 0x143   :  { %v729_v37 = vmin.f32 %v727_v14, %v728_v36 }
 0x144   :  { %v987_v51 = vpop.eup %986 }
 0x145   :  { %v524_v21 = vmul.f32 %v987_v51, %v392_v6  ;;  %v730_v54 = vrot.slane %v729_v37, 1 }
 0x147   :  { %v525_v24 = vmul.f32 %v987_v51, %v524_v21  ;;  %v731_v38 = vmin.f32 %v729_v37, %v730_v54 }
 0x149   :  { %v526_v26 = vmul.f32 0.5, %v525_v24  ;;  %v1331_v41 = vmax.f32 %v731_v38, 0.0 }
 0x14b   :  { %v527_v27 = vsub.f32 1.5, %v526_v26 }
 0x14d   :  { %v528_v55 = vmul.f32 %v987_v51, %v527_v27 }
 0x14f   :  { %v529_v15 = vmul.f32 %v528_v55, %v392_v6 }
 0x151   :  { %v531_v31 = vsel %vm530_vm14, %v392_v6, %v529_v15 }
 0x152   :  { %v534_v33 = vsel %vm532_vm15, %v533_v30, %v531_v31 }
 0x153   :  { %v535_v34 = vsel %vm105_vm8, %v534_v33, 0.0 }
 0x154   :  { %536 = vadd.xlane.f32.xlu0 %v535_v34 }
 0x16c   :  { %s954_s3 = spop %953 }
 0x16d   :  { %s956_s4 = spop %955 }
 0x16e   :  { %s50_s29 = smul.f32 %s956_s4, %s954_s3  ;;  %s958_s30 = spop %957 }
 0x16f   :  { %s130_s8 = smul.f32 %s958_s30, %s956_s4  ;;  %s960_s10 = spop %959 }
 0x170   :  { %52 = sst [smem:[#allocation2 + $0x2]] %s50_s29  ;;  %v1352_v58 = vstv %s960_s10 }
 0x171   :  { %s131_s9 = smul.f32 0.01, %s130_s8  ;;  %vm173_vm3 = vcmp.eq.f32.partialorder %v1352_v58, inf  ;;  %vm175_vm7 = vcmp.eq.f32.partialorder %v1352_v58, 0.0 }
 0x173   :  { %133 = sst [smem:[#allocation2 + $0x3]] %s131_s9 }
 0x17d   :  { %v356_v35 = vpop.xlane.xlu1 %355 }
 0x17e   :  { %v1328_v40 = vmax.f32 %v356_v35, 0.0 }
 0x180   :  { %988 = vrsqrt.f32 %v1328_v40  ;;  %vm400_vm0 = vcmp.eq.f32.partialorder %v1328_v40, inf  ;;  %vm402_vm2 = vcmp.eq.f32.partialorder %v1328_v40, 0.0  ;;  %v403_v18 = vand.u32 2147483648, %v1328_v40 }
 0x181   :  { %990 = vrsqrt.f32 %v1331_v41 }
 0x183   :  { %v366_v42 = vpop.xlane.xlu2 %365 }
 0x184   :  { %v696_v43 = vpop.xlane.xlu0 %695  ;;  %v1338_v32 = vmax.f32 %v366_v42, 0.0 }
 0x185   :  { %v1333_v10 = vmax.f32 %v696_v43, 0.0 }
 0x186   :  { %v989_v45 = vpop.eup %988  ;;  %v463_v19 = vand.u32 2147483648, %v1338_v32 }
 0x187   :  { %v394_v39 = vmul.f32 %v989_v45, %v1328_v40  ;;  %992 = vrsqrt.f32 %v1333_v10  ;;  %v1340_v47 = vpop.eup %990  ;;  %vm740_vm1 = vcmp.eq.f32.partialorder %v1333_v10, inf  ;;  %v743_v17 = vand.u32 2147483648, %v1333_v10 }
 0x188   :  { %994 = vrsqrt.f32 %v1338_v32  ;;  %v863_v56 = vmul.f32 %v1340_v47, %v1331_v41  ;;  %vm742_vm5 = vcmp.eq.f32.partialorder %v1333_v10, 0.0 }
 0x189   :  { %v395_v46 = vmul.f32 %v989_v45, %v394_v39 }
 0x18a   :  { %v864_v63 = vmul.f32 %v1340_v47, %v863_v56 }
 0x18b   :  { %v358_v28 = vpop.xlane.xlu2 %357  ;;  %v396_v25 = vmul.f32 0.5, %v395_v46 }
 0x18c   :  { %v1342_v48 = vmax.f32 %v358_v28, 0.0  ;;  %v698_v49 = vpop.xlane.xlu1 %697  ;;  %v1371_v11 = vmul.f32 0.5, %v864_v63 }
 0x18d   :  { %v993_v50 = vpop.eup %992  ;;  %v1345_v52 = vmax.f32 %v698_v49, 0.0  ;;  %v397_v59 = vsub.f32 1.5, %v396_v25 }
 0x18e   :  { %v734_v53 = vmul.f32 %v993_v50, %v1333_v10  ;;  %996 = vrsqrt.f32 %v1342_v48  ;;  %v1355_v61 = vpop.eup %994  ;;  %v415_v27 = vand.u32 2147483648, %v1342_v48  ;;  %vm412_vm13 = vcmp.eq.f32.partialorder %v1342_v48, inf }
 0x18f   :  { %998 = vrsqrt.f32 %v1345_v52  ;;  %v398_v4 = vmul.f32 %v989_v45, %v397_v59  ;;  %v454_v3 = vmul.f32 %v1355_v61, %v1338_v32  ;;  %v755_v22 = vand.u32 2147483648, %v1345_v52 }
 0x190   :  { %v735_v57 = vmul.f32 %v993_v50, %v734_v53  ;;  %1000 = vrsqrt.f32 %v1352_v58  ;;  %vm752_vm4 = vcmp.eq.f32.partialorder %v1345_v52, inf  ;;  %vm754_vm6 = vcmp.eq.f32.partialorder %v1345_v52, 0.0 }
 0x191   :  { %v399_v16 = vmul.f32 %v398_v4, %v1328_v40  ;;  %v455_v55 = vmul.f32 %v1355_v61, %v454_v3 }
 0x192   :  { %v736_v60 = vmul.f32 0.5, %v735_v57 }
 0x193   :  { %v702_v62 = vpop.xlane.xlu2 %701  ;;  %v401_v14 = vsel %vm400_vm0, %v1328_v40, %v399_v16  ;;  %v1409_v57 = vmul.f32 0.5, %v455_v55 }
 0x194   :  { %v1358_v29 = vpop.eup %996  ;;  %v1360_v0 = vmax.f32 %v702_v62, 0.0  ;;  %v368_v44 = vpop.xlane.xlu1 %367  ;;  %v737_v7 = vsub.f32 1.5, %v736_v60  ;;  %v1418_v62 = vsel %vm402_vm2, %v403_v18, %v401_v14 }
 0x195   :  { %v700_v1 = vpop.xlane.xlu0 %699  ;;  %v999_v23 = vpop.eup %998  ;;  %v406_v9 = vmul.f32 %v1358_v29, %v1342_v48  ;;  %v1394_v37 = vmax.f32 %v368_v44, 0.0 }
 0x196   :  { %v1362_v5 = vmax.f32 %v700_v1, 0.0  ;;  %v746_v6 = vmul.f32 %v999_v23, %v1345_v52  ;;  %1002 = vrsqrt.f32 %v1360_v0  ;;  %v1001_v8 = vpop.eup %1000  ;;  %v738_v20 = vmul.f32 %v993_v50, %v737_v7 }
 0x197   :  { %v167_v13 = vmul.f32 %v1001_v8, %v1352_v58  ;;  %v407_v24 = vmul.f32 %v1358_v29, %v406_v9  ;;  %v176_v50 = vand.u32 2147483648, %v1352_v58  ;;  %vm776_vm11 = vcmp.eq.f32.partialorder %v1360_v0, inf }
 0x198   :  { %v747_v12 = vmul.f32 %v999_v23, %v746_v6  ;;  %1004 = vrsqrt.f32 %v1362_v5  ;;  %v739_v43 = vmul.f32 %v738_v20, %v1333_v10  ;;  %vm764_vm10 = vcmp.eq.f32.partialorder %v1362_v5, inf }
 0x199   :  { %v168_v51 = vmul.f32 %v1001_v8, %v167_v13  ;;  %v408_v28 = vmul.f32 0.5, %v407_v24  ;;  %vm766_vm12 = vcmp.eq.f32.partialorder %v1362_v5, 0.0  ;;  %v767_v3 = vand.u32 2147483648, %v1362_v5 }
 0x19a   :  { %v748_v21 = vmul.f32 0.5, %v747_v12  ;;  %v741_v60 = vsel %vm740_vm1, %v1333_v10, %v739_v43  ;;  %vm778_vm14 = vcmp.eq.f32.partialorder %v1360_v0, 0.0  ;;  %vm414_vm1 = vcmp.eq.f32.partialorder %v1342_v48, 0.0 }
 0x19b   :  { %v360_v26 = vpop.xlane.xlu2 %359  ;;  %v169_v34 = vmul.f32 0.5, %v168_v51  ;;  %v409_v4 = vsub.f32 1.5, %v408_v28  ;;  %v744_v18 = vsel %vm742_vm5, %v743_v17, %v741_v60  ;;  %v779_v51 = vand.u32 2147483648, %v1360_v0 }
 0x19c   :  { %v1003_v15 = vpop.eup %1002  ;;  %v1387_v30 = vmax.f32 %v360_v26, 0.0  ;;  %v704_v31 = vpop.xlane.xlu1 %703  ;;  %v749_v2 = vsub.f32 1.5, %v748_v21 }
 0x19d   :  { %v706_v33 = vpop.xlane.xlu0 %705  ;;  %v770_v36 = vmul.f32 %v1003_v15, %v1360_v0  ;;  %v1396_v54 = vmax.f32 %v704_v31, 0.0  ;;  %v170_v42 = vsub.f32 1.5, %v169_v34  ;;  %v410_v17 = vmul.f32 %v1358_v29, %v409_v4 }
 0x19e   :  { %v1398_v35 = vmax.f32 %v706_v33, 0.0  ;;  %v1005_v38 = vpop.eup %1004  ;;  %1006 = vrsqrt.f32 %v1387_v30  ;;  %v750_v45 = vmul.f32 %v999_v23, %v749_v2  ;;  %vm424_vm5 = vcmp.eq.f32.partialorder %v1387_v30, inf }
 0x19f   :  { %v758_v39 = vmul.f32 %v1005_v38, %v1362_v5  ;;  %1008 = vrsqrt.f32 %v1396_v54  ;;  %v771_v46 = vmul.f32 %v1003_v15, %v770_v36  ;;  %v171_v49 = vmul.f32 %v1001_v8, %v170_v42 }
 0x1a0   :  { %1010 = vrsqrt.f32 %v1398_v35  ;;  %v751_v25 = vmul.f32 %v750_v45, %v1345_v52  ;;  %vm788_vm15 = vcmp.eq.f32.partialorder %v1396_v54, inf  ;;  %vm790_vm0 = vcmp.eq.f32.partialorder %v1396_v54, 0.0 }
 0x1a1   :  { %v759_v53 = vmul.f32 %v1005_v38, %v758_v39  ;;  %v772_v56 = vmul.f32 0.5, %v771_v46  ;;  %1012 = vrsqrt.f32 %v1394_v37  ;;  %v172_v59 = vmul.f32 %v171_v49, %v1352_v58 }
 0x1a2   :  { %v753_v9 = vsel %vm752_vm4, %v1345_v52, %v751_v25  ;;  %v829_v52 = vsel %vm489_vm9, %v744_v18, 0.0  ;;  %v791_v29 = vand.u32 2147483648, %v1396_v54  ;;  %v411_v45 = vmul.f32 %v410_v17, %v1342_v48 }
 0x1a3   :  { %v708_v63 = vpop.xlane.xlu2 %707  ;;  %v760_v44 = vmul.f32 0.5, %v759_v53  ;;  %v773_v1 = vsub.f32 1.5, %v772_v56  ;;  %v174_v40 = vsel %vm173_vm3, %v1352_v58, %v172_v59  ;;  %v756_v10 = vsel %vm754_vm6, %v755_v22, %v753_v9 }
 0x1a4   :  { %v1422_v23 = vpop.eup %1006  ;;  %v1424_v6 = vmax.f32 %v708_v63, 0.0  ;;  %v362_v7 = vpop.xlane.xlu1 %361  ;;  %v177_v16 = vsel %vm175_vm7, %v176_v50, %v174_v40  ;;  %v457_v22 = vsub.f32 1.5, %v1409_v57  ;;  %v830_v43 = vsel %vm489_vm9, %v756_v10, 0.0 }
 0x1a5   :  { %v364_v8 = vpop.xlane.xlu0 %363  ;;  %v1009_v12 = vpop.eup %1008  ;;  %v1434_v13 = vmax.f32 %v362_v7, 0.0  ;;  %961 = vpush %v177_v16  ;;  %v761_v21 = vsub.f32 1.5, %v760_v44  ;;  %v774_v24 = vmul.f32 %v1003_v15, %v773_v1  ;;  %v418_v2 = vmul.f32 %v1422_v23, %v1387_v30 }
 0x1a6   :  { %v1011_v20 = vpop.eup %1010  ;;  %1014 = vrsqrt.f32 %v1424_v6  ;;  %v782_v26 = vmul.f32 %v1009_v12, %v1396_v54  ;;  %v1456_v15 = vmax.f32 %v364_v8, 0.0  ;;  %vm800_vm2 = vcmp.eq.f32.partialorder %v1398_v35, inf }
 0x1a7   :  { %1016 = vrsqrt.f32 %v1434_v13  ;;  %v794_v58 = vmul.f32 %v1011_v20, %v1398_v35  ;;  %v1454_v55 = vpop.eup %1012  ;;  %v762_v31 = vmul.f32 %v1005_v38, %v761_v21  ;;  %v775_v33 = vmul.f32 %v774_v24, %v1360_v0 }
 0x1a8   :  { %v783_v34 = vmul.f32 %v1009_v12, %v782_v26  ;;  %1018 = vrsqrt.f32 %v1456_v15  ;;  %v419_v60 = vmul.f32 %v1422_v23, %v418_v2  ;;  %v803_v4 = vand.u32 2147483648, %v1398_v35 }
 0x1a9   :  { %v795_v14 = vmul.f32 %v1011_v20, %v794_v58  ;;  %v763_v36 = vmul.f32 %v762_v31, %v1362_v5  ;;  %v777_v49 = vsel %vm776_vm11, %v1360_v0, %v775_v33  ;;  %v831_v40 = vadd.f32 %v830_v43, %v829_v52 }
 0x1aa   :  { %v784_v42 = vmul.f32 0.5, %v783_v34  ;;  %v780_v9 = vsel %vm778_vm14, %v779_v51, %v777_v49  ;;  %vm802_vm3 = vcmp.eq.f32.partialorder %v1398_v35, 0.0  ;;  %vm812_vm4 = vcmp.eq.f32.partialorder %v1424_v6, inf }
 0x1ab   :  { %v796_v38 = vmul.f32 0.5, %v795_v14  ;;  %v765_v28 = vsel %vm764_vm10, %v1362_v5, %v763_v36  ;;  %v413_v5 = vsel %vm412_vm13, %v1342_v48, %v411_v45  ;;  %v815_v51 = vand.u32 2147483648, %v1424_v6 }
 0x1ac   :  { %v1015_v39 = vpop.eup %1014  ;;  %v710_v46 = vpop.xlane.xlu1 %709  ;;  %v785_v25 = vsub.f32 1.5, %v784_v42  ;;  %v768_v56 = vsel %vm766_vm12, %v767_v3, %v765_v28  ;;  %v1509_v31 = vsel %vm414_vm1, %v415_v27, %v413_v5  ;;  %vm814_vm6 = vcmp.eq.f32.partialorder %v1424_v6, 0.0 }
 0x1ad   :  { %v1017_v50 = vpop.eup %1016  ;;  %v1478_v53 = vmax.f32 %v710_v46, 0.0  ;;  %v797_v59 = vsub.f32 1.5, %v796_v38  ;;  %v370_v44 = vpop.xlane.xlu0 %369  ;;  %v806_v7 = vmul.f32 %v1015_v39, %v1424_v6  ;;  %v832_v16 = vsel %vm489_vm9, %v768_v56, 0.0 }
 0x1ae   :  { %v430_v63 = vmul.f32 %v1017_v50, %v1434_v13  ;;  %v786_v1 = vmul.f32 %v1009_v12, %v785_v25  ;;  %v1495_v18 = vmax.f32 %v370_v44, 0.0  ;;  %v1019_v26 = vpop.eup %1018  ;;  %v833_v17 = vadd.f32 %v832_v16, %v831_v40 }
 0x1af   :  { %1020 = vrsqrt.f32 %v1478_v53  ;;  %v798_v8 = vmul.f32 %v1011_v20, %v797_v59  ;;  %v807_v12 = vmul.f32 %v1015_v39, %v806_v7  ;;  %v420_v20 = vmul.f32 0.5, %v419_v60 }
 0x1b0   :  { %v787_v3 = vmul.f32 %v786_v1, %v1396_v54  ;;  %v431_v24 = vmul.f32 %v1017_v50, %v430_v63  ;;  %v834_v2 = vsel %vm489_vm9, %v780_v9, 0.0  ;;  %v427_v14 = vand.u32 2147483648, %v1387_v30 }
 0x1b1   :  { %v799_v21 = vmul.f32 %v798_v8, %v1398_v35  ;;  %v808_v0 = vmul.f32 0.5, %v807_v12  ;;  %v421_v33 = vsub.f32 1.5, %v420_v20  ;;  %1022 = vrsqrt.f32 %v1495_v18 }
 0x1b2   :  { %v789_v10 = vsel %vm788_vm15, %v1396_v54, %v787_v3  ;;  %v432_v52 = vmul.f32 0.5, %v431_v24  ;;  %v442_v36 = vmul.f32 %v1019_v26, %v1456_v15  ;;  %vm426_vm7 = vcmp.eq.f32.partialorder %v1387_v30, 0.0 }
 0x1b3   :  { %v792_v58 = vsel %vm790_vm0, %v791_v29, %v789_v10  ;;  %v809_v34 = vsub.f32 1.5, %v808_v0  ;;  %v801_v48 = vsel %vm800_vm2, %v1398_v35, %v799_v21  ;;  %v422_v27 = vmul.f32 %v1422_v23, %v421_v33 }
 0x1b4   :  { %v836_v38 = vsel %vm489_vm9, %v792_v58, 0.0  ;;  %v433_v43 = vsub.f32 1.5, %v432_v52  ;;  %v827_v45 = vand.u32 2147483648, %v1478_v53  ;;  %v835_v46 = vadd.f32 %v834_v2, %v833_v17 }
 0x1b5   :  { %v1021_v54 = vpop.eup %1020  ;;  %v810_v42 = vmul.f32 %v1015_v39, %v809_v34  ;;  %vm436_vm10 = vcmp.eq.f32.partialorder %v1434_v13, inf  ;;  %v443_v28 = vmul.f32 %v1019_v26, %v442_v36  ;;  %v423_v23 = vmul.f32 %v422_v27, %v1387_v30 }
 0x1b6   :  { %v818_v29 = vmul.f32 %v1021_v54, %v1478_v53  ;;  %v434_v56 = vmul.f32 %v1017_v50, %v433_v43  ;;  %v804_v39 = vsel %vm802_vm3, %v803_v4, %v801_v48  ;;  %vm824_vm11 = vcmp.eq.f32.partialorder %v1478_v53, inf }
 0x1b7   :  { %v811_v49 = vmul.f32 %v810_v42, %v1424_v6  ;;  %v837_v59 = vadd.f32 %v836_v38, %v835_v46  ;;  %v444_v60 = vmul.f32 0.5, %v443_v28  ;;  %v466_v63 = vmul.f32 %v1454_v55, %v1394_v37  ;;  %v1023_v35 = vpop.eup %1022 }
 0x1b8   :  { %v819_v25 = vmul.f32 %v1021_v54, %v818_v29  ;;  %vm826_vm12 = vcmp.eq.f32.partialorder %v1478_v53, 0.0  ;;  %v435_v7 = vmul.f32 %v434_v56, %v1434_v13  ;;  %vm438_vm13 = vcmp.eq.f32.partialorder %v1434_v13, 0.0 }
 0x1b9   :  { %v813_v44 = vsel %vm812_vm4, %v1424_v6, %v811_v49  ;;  %vm460_vm14 = vcmp.eq.f32.partialorder %v1338_v32, inf  ;;  %v439_v50 = vand.u32 2147483648, %v1434_v13  ;;  %v445_v4 = vsub.f32 1.5, %v444_v60 }
 0x1ba   :  { %v820_v1 = vmul.f32 0.5, %v819_v25  ;;  %v458_v8 = vmul.f32 %v1355_v61, %v457_v22  ;;  %v467_v40 = vmul.f32 %v1454_v55, %v466_v63  ;;  %v838_v9 = vsel %vm489_vm9, %v804_v39, 0.0 }
 0x1bb   :  { %v425_v3 = vsel %vm424_vm5, %v1387_v30, %v423_v23  ;;  %vm448_vm15 = vcmp.eq.f32.partialorder %v1456_v15, inf  ;;  %v816_v12 = vsel %vm814_vm6, %v815_v51, %v813_v44  ;;  %v839_v16 = vadd.f32 %v838_v9, %v837_v59 }
 0x1bc   :  { %v821_v5 = vsub.f32 1.5, %v820_v1  ;;  %v446_v21 = vmul.f32 %v1019_v26, %v445_v4  ;;  %vm450_vm0 = vcmp.eq.f32.partialorder %v1456_v15, 0.0  ;;  %v437_v61 = vsel %vm436_vm10, %v1434_v13, %v435_v7 }
 0x1bd   :  { %v468_v22 = vmul.f32 0.5, %v467_v40  ;;  %v478_v20 = vmul.f32 %v1023_v35, %v1495_v18  ;;  %v428_v24 = vsel %vm426_vm7, %v427_v14, %v425_v3  ;;  %v451_v6 = vand.u32 2147483648, %v1456_v15 }
 0x1be   :  { %v822_v57 = vmul.f32 %v1021_v54, %v821_v5  ;;  %v447_v10 = vmul.f32 %v446_v21, %v1456_v15  ;;  %v459_v0 = vmul.f32 %v458_v8, %v1338_v32  ;;  %v840_v51 = vsel %vm489_vm9, %v816_v12, 0.0 }
 0x1bf   :  { %v469_v58 = vsub.f32 1.5, %v468_v22  ;;  %v479_v17 = vmul.f32 %v1023_v35, %v478_v20  ;;  %v440_v33 = vsel %vm438_vm13, %v439_v50, %v437_v61  ;;  %v490_v34 = vsel %vm489_vm9, %v1418_v62, 0.0 }
 0x1c0   :  { %v823_v26 = vmul.f32 %v822_v57, %v1478_v53  ;;  %v449_v30 = vsel %vm448_vm15, %v1456_v15, %v447_v10  ;;  %v491_v2 = vsel %vm489_vm9, %v1509_v31, 0.0  ;;  %v493_v13 = vsel %vm489_vm9, %v428_v24, 0.0 }
 0x1c1   :  { %v470_v52 = vmul.f32 %v1454_v55, %v469_v58  ;;  %v480_v54 = vmul.f32 0.5, %v479_v17  ;;  %v841_v27 = vadd.f32 %v840_v51, %v839_v16  ;;  %v461_v62 = vsel %vm460_vm14, %v1338_v32, %v459_v0 }
 0x1c2   :  { %v825_v14 = vsel %vm824_vm11, %v1478_v53, %v823_v26  ;;  %v492_v36 = vadd.f32 %v491_v2, %v490_v34  ;;  %v495_v38 = vsel %vm489_vm9, %v440_v33, 0.0  ;;  %v452_v43 = vsel %vm450_vm0, %v451_v6, %v449_v30 }
 0x1c3   :  { %v828_v48 = vsel %vm826_vm12, %v827_v45, %v825_v14  ;;  %v471_v42 = vmul.f32 %v470_v52, %v1394_v37  ;;  %v481_v29 = vsub.f32 1.5, %v480_v54  ;;  %vm472_vm1 = vcmp.eq.f32.partialorder %v1394_v37, inf }
 0x1c4   :  { %v842_v31 = vsel %vm489_vm9, %v828_v48, 0.0  ;;  %v494_v53 = vadd.f32 %v493_v13, %v492_v36  ;;  %vm462_vm2 = vcmp.eq.f32.partialorder %v1338_v32, 0.0  ;;  %v866_v28 = vsub.f32 1.5, %v1371_v11 }
 0x1c5   :  { %v843_v55 = vadd.f32 %v842_v31, %v841_v27  ;;  %v473_v45 = vsel %vm472_vm1, %v1394_v37, %v471_v42  ;;  %v482_v46 = vmul.f32 %v1023_v35, %v481_v29  ;;  %v464_v49 = vsel %vm462_vm2, %v463_v19, %v461_v62 }
 0x1c6   :  { %v475_v25 = vand.u32 2147483648, %v1394_v37  ;;  %v496_v23 = vadd.f32 %v495_v38, %v494_v53  ;;  %vm474_vm3 = vcmp.eq.f32.partialorder %v1394_v37, 0.0  ;;  %v497_v56 = vsel %vm489_vm9, %v452_v43, 0.0 }
 0x1c7   :  { %844 = vadd.xlane.f32.xlu1 %v843_v55  ;;  %v483_v15 = vmul.f32 %v482_v46, %v1495_v18  ;;  %vm484_vm4 = vcmp.eq.f32.partialorder %v1495_v18, inf  ;;  %v487_v59 = vand.u32 2147483648, %v1495_v18  ;;  %vm486_vm5 = vcmp.eq.f32.partialorder %v1495_v18, 0.0  ;;  %v537_v9 = vpop.xlane.xlu0 %536 }
 0x1c8   :  { %v476_v39 = vsel %vm474_vm3, %v475_v25, %v473_v45  ;;  %v498_v60 = vadd.f32 %v497_v56, %v496_v23  ;;  %v499_v32 = vsel %vm489_vm9, %v464_v49, 0.0  ;;  %v867_v19 = vmul.f32 %v1340_v47, %v866_v28 }
 0x1c9   :  { %v485_v11 = vsel %vm484_vm4, %v1495_v18, %v483_v15  ;;  %v501_v44 = vsel %vm489_vm9, %v476_v39, 0.0  ;;  %vm869_vm6 = vcmp.eq.f32.partialorder %v1331_v41, inf  ;;  %v872_v18 = vand.u32 2147483648, %v1331_v41 }
 0x1ca   :  { %v488_v63 = vsel %vm486_vm5, %v487_v59, %v485_v11  ;;  %v500_v37 = vadd.f32 %v499_v32, %v498_v60  ;;  %v868_v35 = vmul.f32 %v867_v19, %v1331_v41  ;;  %vm871_vm7 = vcmp.eq.f32.partialorder %v1331_v41, 0.0 }
 0x1cb   :  { %v503_v1 = vsel %vm489_vm9, %v488_v63, 0.0  ;;  %v1044_v40 = vmov 64.0   ;;  %v1045_v5 = vmov 128.0   ;;  %v538_v16 = vrot.slane %v537_v9, 4 }
 0x1cc   :  { %v502_v7 = vadd.f32 %v501_v44, %v500_v37  ;;  %v870_v4 = vsel %vm869_vm6, %v1331_v41, %v868_v35  ;;  %1024 = vrcp.f32 %v1044_v40 }
 0x1cd   :  { %v873_v47 = vsel %vm871_vm7, %v872_v18, %v870_v4  ;;  %1026 = vrcp.f32 %v1045_v5  ;;  %v539_v22 = vadd.f32 %v538_v16, %v537_v9 }
 0x1ce   :  { %v504_v50 = vadd.f32 %v503_v1, %v502_v7  ;;  %v874_v8 = vsel %vm105_vm8, %v873_v47, 0.0 }
 0x1cf   :  { %v540_v10 = vrot.slane %v539_v22, 2 }
 0x1d0   :  { %505 = vadd.xlane.f32.xlu2 %v504_v50 }
 0x1d1   :  { %v541_v33 = vadd.f32 %v540_v10, %v539_v22 }
 0x1d2   :  { %v1025_v12 = vpop.eup %1024 }
 0x1d3   :  { %v1027_v57 = vpop.eup %1026  ;;  %v515_v61 = vmul.f32 64.0, %v1025_v12  ;;  %vm519_vm8 = vweird.f32 %v1025_v12  ;;  %v542_v13 = vrot.slane %v541_v33, 1 }
 0x1d4   :  { %v546_v20 = vmul.f32 128.0, %v1027_v57  ;;  %vm550_vm9 = vweird.f32 %v1027_v57 }
 0x1d5   :  { %v516_v24 = vsub.f32 1.0, %v515_v61  ;;  %v543_v55 = vadd.f32 %v542_v13, %v541_v33 }
 0x1d6   :  { %s962_s11 = spop %961  ;;  %v547_v51 = vsub.f32 1.0, %v546_v20 }
 0x1d7   :  { %s179_s12 = smul.f32 0.001, %s962_s11  ;;  %v517_v17 = vmul.f32 %v1025_v12, %v516_v24 }
 0x1d8   :  { %875 = vadd.xlane.f32.xlu2 %v874_v8  ;;  %v548_v2 = vmul.f32 %v1027_v57, %v547_v51 }
 0x1d9   :  { %181 = sst [smem:[#allocation2 + $0x4]] %s179_s12  ;;  %v518_v52 = vadd.f32 %v1025_v12, %v517_v17 }
 0x1da   :  { %v549_v62 = vadd.f32 %v1027_v57, %v548_v2 }
 0x1db   :  { %v520_v29 = vsel %vm519_vm8, %v1025_v12, %v518_v52 }
 0x1dc   :  { %v551_v43 = vsel %vm550_vm9, %v1027_v57, %v549_v62 }
 0x23a   :  { %v845_v3 = vpop.xlane.xlu1 %844 }
 0x23b   :  { %v846_v21 = vrot.slane %v845_v3, 4 }
 0x23d   :  { %v847_v41 = vadd.f32 %v846_v21, %v845_v3 }
 0x23f   :  { %v848_v0 = vrot.slane %v847_v41, 2 }
 0x241   :  { %v849_v30 = vadd.f32 %v848_v0, %v847_v41 }
 0x243   :  { %v506_v6 = vpop.xlane.xlu2 %505  ;;  %v850_v36 = vrot.slane %v849_v30, 1 }
 0x244   :  { %v507_v26 = vrot.slane %v506_v6, 4 }
 0x245   :  { %v851_v53 = vadd.f32 %v850_v36, %v849_v30 }
 0x246   :  { %v508_v58 = vadd.f32 %v507_v26, %v506_v6 }
 0x248   :  { %v509_v34 = vrot.slane %v508_v58, 2 }
 0x24a   :  { %v510_v14 = vadd.f32 %v509_v34, %v508_v58 }
 0x24b   :  { %v876_v54 = vpop.xlane.xlu2 %875 }
 0x24c   :  { %v877_v48 = vrot.slane %v876_v54, 4  ;;  %v511_v27 = vrot.slane %v510_v14, 1 }
 0x24e   :  { %v878_v31 = vadd.f32 %v877_v48, %v876_v54  ;;  %v512_v42 = vadd.f32 %v511_v27, %v510_v14 }
 0x250   :  { %v879_v38 = vrot.slane %v878_v31, 2  ;;  %963 = vpush %v512_v42 }
 0x251   :  { %965 = vpush %v520_v29 }
 0x252   :  { %v880_v45 = vadd.f32 %v879_v38, %v878_v31  ;;  %967 = vpush %v543_v55 }
 0x253   :  { %969 = vpush %v551_v43 }
 0x254   :  { %971 = vpush %v851_v53  ;;  %v881_v46 = vrot.slane %v880_v45, 1 }
 0x256   :  { %v882_v28 = vadd.f32 %v881_v46, %v880_v45 }
 0x258   :  { %973 = vpush %v882_v28 }
 0x281   :  { %s964_s13 = spop %963 }
 0x282   :  { %s966_s14 = spop %965 }
 0x283   :  { %s522_s15 = smul.f32 %s966_s14, %s964_s13  ;;  %s968_s16 = spop %967 }
 0x284   :  { %s970_s17 = spop %969 }
 0x285   :  { %s553_s18 = smul.f32 %s970_s17, %s968_s16  ;;  %s972_s19 = spop %971 }
 0x286   :  { %s861_s20 = smul.f32 %s972_s19, %s966_s14 }
 0x287   :  { %s554_s0 = sadd.f32 %s553_s18, %s522_s15 }
 0x289   :  { %s555_s21 = smul.f32 0.1, %s554_s0  ;;  %s974_s22 = spop %973 }
 0x28a   :  { %s892_s23 = smul.f32 %s974_s22, %s970_s17 }
 0x28b   :  { %557 = sst [smem:[#allocation2]] %s555_s21 }
 0x28c   :  { %s893_s1 = sadd.f32 %s892_s23, %s861_s20 }
 0x28e   :  { %s894_s6 = smul.f32 0.1, %s893_s1 }
 0x290   :  { %896 = sst [smem:[#allocation2 + $0x1]] %s894_s6 }
 0x291   :  { %905 = dma.smem_to_vmem %s1046_s26, 16, %s903_s25, [#allocation3]  }
 0x292   :  { %1040 = dma.done.wait [#allocation3], 16  }
 0x293   :  { %1041 = vsyncadd [#allocation3], 4294967280 }
 0x294   :  { %910 = sfence }
 0x295   :  { %911 = vsyncpa [#allocation3], 1 }

</bundles_post_ra>
